<compile_context>
chip_gen: v7x
topology: tpu7x:2x2x1
jax: 0.10.0
libtpu: 0.0.40
codegen_flags: <defaults>
</compile_context>

<pallas_src>
import jax
import jax.numpy as jnp
from jax import lax
from jax.experimental import pallas as pl
from jax.experimental.pallas import tpu as pltpu

ATTENTION_HEAD_NUM = 4
BATCH_SIZE = 2
EMBEDDING_DEPTH = 256
HEAD_DIM = EMBEDDING_DEPTH // ATTENTION_HEAD_NUM  # 64


def mha_kernel(x_ref, wqvk_ref, bqvk_ref, wp_ref, bp_ref, o_ref):
    E, D, H = EMBEDDING_DEPTH, HEAD_DIM, ATTENTION_HEAD_NUM
    x = x_ref[0]  # (N, E) — one batch element per grid step

    # Fused projection: columns are [ Q (E) | V (E) | K summed over heads (D) ].
    qvk = jnp.dot(x, wqvk_ref[...], preferred_element_type=jnp.float32) + bqvk_ref[...]
    q = qvk[:, :E]                      # (N, E)
    v = qvk[:, E:2 * E]                 # (N, E)
    k_sum = qvk[:, 2 * E:2 * E + D]     # (N, D) — K already head-summed (reference quirk)

    scale = 1.0 / (E ** 0.5)

    # Accumulate the output projection per head; start from residual + projection bias.
    acc = x + bp_ref[...]               # (N, E)
    for h in range(H):
        q_h = q[:, h * D:(h + 1) * D]   # (N, D)
        v_h = v[:, h * D:(h + 1) * D]   # (N, D)

        # Q_h · K_sum^T without materializing a transpose: contract feature dims.
        energy = lax.dot_general(
            q_h, k_sum,
            dimension_numbers=(((1,), (1,)), ((), ())),
            preferred_element_type=jnp.float32)          # (N, N)

        # Softmax over last axis; reference divides by sqrt(E) AFTER softmax.
        e_max = jnp.max(energy, axis=-1, keepdims=True)
        p = jnp.exp(energy - e_max)
        inv = pl.reciprocal(jnp.sum(p, axis=-1, keepdims=True), approx=False)
        att = p * (inv * scale)
        # TODO(synk): nn.Dropout(0.5) is random in train mode; eval-mode identity here.

        out_h = jnp.dot(att, v_h, preferred_element_type=jnp.float32)   # (N, D)
        acc = acc + jnp.dot(out_h, wp_ref[pl.ds(h * D, D), :],
                            preferred_element_type=jnp.float32)         # (N, E)

    o_ref[0] = acc.astype(o_ref.dtype)


@jax.jit
def multi_head_attention(x, wq, bq, wk, bk, wv, bv, wp, bp):
    B, N, E = x.shape
    H, D = ATTENTION_HEAD_NUM, HEAD_DIM

    # Algebra of the reference einsum quirk: sum_h (x @ Wk_h + bk_h) == x @ (sum_h Wk_h) + sum_h bk_h
    wk_sum = wk.reshape(E, H, D).sum(axis=1)            # (E, D)
    bk_sum = bk.reshape(1, H, D).sum(axis=1)            # (1, D)

    # Fuse Q, V and summed-K projections into one lane-dense matmul.
    w_qvk = jnp.concatenate([wq, wv, wk_sum], axis=1)   # (E, 2E + D)
    b_qvk = jnp.concatenate([bq, bv, bk_sum], axis=1)   # (1, 2E + D)
    F = 2 * E + D

    return pl.pallas_call(
        mha_kernel,
        out_shape=jax.ShapeDtypeStruct((B, N, E), x.dtype),
        grid_spec=pltpu.PrefetchScalarGridSpec(
            num_scalar_prefetch=0,
            grid=(B,),   # parallel over batch: both TCs on v7x; trivial extra step on v5e/v6e
            in_specs=[
                pl.BlockSpec((1, N, E), lambda b: (b, 0, 0)),   # x
                pl.BlockSpec((E, F), lambda b: (0, 0)),         # fused QVK weight (resident)
                pl.BlockSpec((1, F), lambda b: (0, 0)),         # fused QVK bias
                pl.BlockSpec((E, E), lambda b: (0, 0)),         # projection weight
                pl.BlockSpec((1, E), lambda b: (0, 0)),         # projection bias
            ],
            out_specs=pl.BlockSpec((1, N, E), lambda b: (b, 0, 0)),
        ),
        compiler_params=pltpu.CompilerParams(
            dimension_semantics=("parallel",)),
    )(x, w_qvk, b_qvk, wp, bp)


def init_linear(key, in_f, out_f):
    # Deterministic init mimicking PyTorch Linear default (uniform +-1/sqrt(in)).
    kw, kb = jax.random.split(key)
    bound = 1.0 / (in_f ** 0.5)
    w = jax.random.uniform(kw, (in_f, out_f), jnp.float32, -bound, bound)  # (in, out)
    b = jax.random.uniform(kb, (1, out_f), jnp.float32, -bound, bound)
    return w, b


def ref_forward(x, wq, bq, wk, bk, wv, bv, wp, bp):
    """Pure-JAX reference mirroring the PyTorch forward (eval-mode dropout)."""
    B, N, E = x.shape
    H, D = ATTENTION_HEAD_NUM, HEAD_DIM
    q = (x @ wq + bq).reshape(B, N, H, D).transpose(0, 2, 1, 3)
    k = (x @ wk + bk).reshape(B, N, H, D).transpose(0, 2, 1, 3)
    v = (x @ wv + bv).reshape(B, N, H, D).transpose(0, 2, 1, 3)
    energy = jnp.einsum('bhqd,bnkd->bhqk', q, k)            # sums K over heads (quirk)
    att = jax.nn.softmax(energy, axis=-1) / (E ** 0.5)
    out = jnp.einsum('bhqk,bhkd->bhqd', att, v)
    out = out.transpose(0, 2, 1, 3).reshape(B, N, E)
    return out @ wp + bp + x


if __name__ == "__main__":
    B, N, E = BATCH_SIZE, 8, EMBEDDING_DEPTH
    key = jax.random.PRNGKey(0)
    kx, kq, kk, kv, kp = jax.random.split(key, 5)

    x = jax.random.normal(kx, (B, N, E), jnp.float32)
    wq, bq = init_linear(kq, E, E)
    wk, bk = init_linear(kk, E, E)
    wv, bv = init_linear(kv, E, E)
    wp, bp = init_linear(kp, E, E)

    out = multi_head_attention(x, wq, bq, wk, bk, wv, bv, wp, bp)
    out = jax.block_until_ready(out)

    ref = ref_forward(x, wq, bq, wk, bk, wv, bv, wp, bp)
    assert out.shape == (B, N, E)
    assert jnp.allclose(out, ref, atol=1e-4, rtol=1e-4), \
        f"max abs err {jnp.max(jnp.abs(out - ref))}"
    print("KERNEL_OK")
</pallas_src>

<mosaic_0001>
module attributes {stable_mosaic.version = 11 : i64} {
  func.func @mha_kernel(%arg0: i32, %arg1: memref<1x8x256xf32, #tpu.memory_space<vmem>>, %arg2: memref<256x576xf32, #tpu.memory_space<vmem>>, %arg3: memref<1x576xf32, #tpu.memory_space<vmem>>, %arg4: memref<256x256xf32, #tpu.memory_space<vmem>>, %arg5: memref<1x256xf32, #tpu.memory_space<vmem>>, %arg6: memref<1x8x256xf32, #tpu.memory_space<vmem>>) attributes {dimension_semantics = [#tpu.dimension_semantics<parallel>], iteration_bounds = array<i64: 2>, scalar_prefetch = 0 : i64, scratch_operands = 0 : i64, tpu.core_type = #tpu.core_type<tc>, window_params = [{transform_indices = @transform_0, window_bounds = array<i64: 1, 8, 256>}, {pipeline_mode = #tpu.pipeline_mode<synchronous>, transform_indices = @transform_1, window_bounds = array<i64: 256, 576>}, {pipeline_mode = #tpu.pipeline_mode<synchronous>, transform_indices = @transform_2, window_bounds = array<i64: 1, 576>}, {pipeline_mode = #tpu.pipeline_mode<synchronous>, transform_indices = @transform_3, window_bounds = array<i64: 256, 256>}, {pipeline_mode = #tpu.pipeline_mode<synchronous>, transform_indices = @transform_4, window_bounds = array<i64: 1, 256>}, {transform_indices = @transform_5, window_bounds = array<i64: 1, 8, 256>}]} {
    %c0 = arith.constant 0 : index
    %c0_0 = arith.constant 0 : index
    %c0_1 = arith.constant 0 : index
    %0 = vector.load %arg1[%c0, %c0_0, %c0_1] : memref<1x8x256xf32, #tpu.memory_space<vmem>>, vector<1x8x256xf32>
    %1 = vector.shape_cast %0 : vector<1x8x256xf32> to vector<8x256xf32>
    %c0_2 = arith.constant 0 : index
    %c0_3 = arith.constant 0 : index
    %2 = vector.load %arg2[%c0_2, %c0_3] : memref<256x576xf32, #tpu.memory_space<vmem>>, vector<256x576xf32>
    %cst = arith.constant dense<0.000000e+00> : vector<8x576xf32>
    %3 = tpu.matmul %1, %2, %cst {dimension_numbers = #tpu.dot_dimension_numbers<[1], [0], [0], [1], [0, 0, 1, 1], [], []>} : vector<8x256xf32>, vector<256x576xf32>, vector<8x576xf32> -> vector<8x576xf32>
    %c0_4 = arith.constant 0 : index
    %c0_5 = arith.constant 0 : index
    %4 = vector.load %arg3[%c0_4, %c0_5] : memref<1x576xf32, #tpu.memory_space<vmem>>, vector<1x576xf32>
    %5 = vector.broadcast %4 : vector<1x576xf32> to vector<8x576xf32>
    %6 = arith.addf %3, %5 : vector<8x576xf32>
    %7 = vector.extract_strided_slice %6 {offsets = [0, 0], sizes = [8, 256], strides = [1, 1]} : vector<8x576xf32> to vector<8x256xf32>
    %8 = vector.extract_strided_slice %6 {offsets = [0, 256], sizes = [8, 256], strides = [1, 1]} : vector<8x576xf32> to vector<8x256xf32>
    %9 = vector.extract_strided_slice %6 {offsets = [0, 512], sizes = [8, 64], strides = [1, 1]} : vector<8x576xf32> to vector<8x64xf32>
    %c0_6 = arith.constant 0 : index
    %c0_7 = arith.constant 0 : index
    %10 = vector.load %arg5[%c0_6, %c0_7] : memref<1x256xf32, #tpu.memory_space<vmem>>, vector<1x256xf32>
    %11 = vector.broadcast %10 : vector<1x256xf32> to vector<8x256xf32>
    %12 = arith.addf %1, %11 : vector<8x256xf32>
    %13 = vector.extract_strided_slice %7 {offsets = [0, 0], sizes = [8, 64], strides = [1, 1]} : vector<8x256xf32> to vector<8x64xf32>
    %14 = vector.extract_strided_slice %8 {offsets = [0, 0], sizes = [8, 64], strides = [1, 1]} : vector<8x256xf32> to vector<8x64xf32>
    %cst_8 = arith.constant dense<0.000000e+00> : vector<8x8xf32>
    %15 = tpu.matmul %13, %9, %cst_8 {dimension_numbers = #tpu.dot_dimension_numbers<[1], [1], [0], [0], [0, 0, 1, 0], [], []>} : vector<8x64xf32>, vector<8x64xf32>, vector<8x8xf32> -> vector<8x8xf32>
    %cst_9 = arith.constant dense<0xFF800000> : vector<8xf32>
    %16 = vector.multi_reduction <maximumf>, %15, %cst_9 [1] : vector<8x8xf32> to vector<8xf32>
    %17 = vector.shape_cast %16 : vector<8xf32> to vector<8x1xf32>
    %18 = vector.broadcast %17 : vector<8x1xf32> to vector<8x8xf32>
    %19 = arith.subf %15, %18 : vector<8x8xf32>
    %20 = math.exp %19 : vector<8x8xf32>
    %cst_10 = arith.constant dense<0.000000e+00> : vector<8xf32>
    %21 = vector.multi_reduction <add>, %20, %cst_10 [1] : vector<8x8xf32> to vector<8xf32>
    %22 = vector.shape_cast %21 : vector<8xf32> to vector<8x1xf32>
    %23 = tpu.reciprocal %22 : vector<8x1xf32> -> vector<8x1xf32>
    %cst_11 = arith.constant 6.250000e-02 : f32
    %24 = vector.broadcast %cst_11 : f32 to vector<8x1xf32>
    %25 = arith.mulf %23, %24 : vector<8x1xf32>
    %26 = vector.broadcast %25 : vector<8x1xf32> to vector<8x8xf32>
    %27 = arith.mulf %20, %26 : vector<8x8xf32>
    %cst_12 = arith.constant dense<0.000000e+00> : vector<8x64xf32>
    %28 = tpu.matmul %27, %14, %cst_12 {dimension_numbers = #tpu.dot_dimension_numbers<[1], [0], [0], [1], [0, 0, 1, 1], [], []>} : vector<8x8xf32>, vector<8x64xf32>, vector<8x64xf32> -> vector<8x64xf32>
    %c0_13 = arith.constant 0 : index
    %c0_14 = arith.constant 0 : index
    %29 = vector.load %arg4[%c0_13, %c0_14] : memref<256x256xf32, #tpu.memory_space<vmem>>, vector<64x256xf32>
    %cst_15 = arith.constant dense<0.000000e+00> : vector<8x256xf32>
    %30 = tpu.matmul %28, %29, %cst_15 {dimension_numbers = #tpu.dot_dimension_numbers<[1], [0], [0], [1], [0, 0, 1, 1], [], []>} : vector<8x64xf32>, vector<64x256xf32>, vector<8x256xf32> -> vector<8x256xf32>
    %31 = arith.addf %12, %30 : vector<8x256xf32>
    %32 = vector.extract_strided_slice %7 {offsets = [0, 64], sizes = [8, 64], strides = [1, 1]} : vector<8x256xf32> to vector<8x64xf32>
    %33 = vector.extract_strided_slice %8 {offsets = [0, 64], sizes = [8, 64], strides = [1, 1]} : vector<8x256xf32> to vector<8x64xf32>
    %cst_16 = arith.constant dense<0.000000e+00> : vector<8x8xf32>
    %34 = tpu.matmul %32, %9, %cst_16 {dimension_numbers = #tpu.dot_dimension_numbers<[1], [1], [0], [0], [0, 0, 1, 0], [], []>} : vector<8x64xf32>, vector<8x64xf32>, vector<8x8xf32> -> vector<8x8xf32>
    %cst_17 = arith.constant dense<0xFF800000> : vector<8xf32>
    %35 = vector.multi_reduction <maximumf>, %34, %cst_17 [1] : vector<8x8xf32> to vector<8xf32>
    %36 = vector.shape_cast %35 : vector<8xf32> to vector<8x1xf32>
    %37 = vector.broadcast %36 : vector<8x1xf32> to vector<8x8xf32>
    %38 = arith.subf %34, %37 : vector<8x8xf32>
    %39 = math.exp %38 : vector<8x8xf32>
    %cst_18 = arith.constant dense<0.000000e+00> : vector<8xf32>
    %40 = vector.multi_reduction <add>, %39, %cst_18 [1] : vector<8x8xf32> to vector<8xf32>
    %41 = vector.shape_cast %40 : vector<8xf32> to vector<8x1xf32>
    %42 = tpu.reciprocal %41 : vector<8x1xf32> -> vector<8x1xf32>
    %cst_19 = arith.constant 6.250000e-02 : f32
    %43 = vector.broadcast %cst_19 : f32 to vector<8x1xf32>
    %44 = arith.mulf %42, %43 : vector<8x1xf32>
    %45 = vector.broadcast %44 : vector<8x1xf32> to vector<8x8xf32>
    %46 = arith.mulf %39, %45 : vector<8x8xf32>
    %cst_20 = arith.constant dense<0.000000e+00> : vector<8x64xf32>
    %47 = tpu.matmul %46, %33, %cst_20 {dimension_numbers = #tpu.dot_dimension_numbers<[1], [0], [0], [1], [0, 0, 1, 1], [], []>} : vector<8x8xf32>, vector<8x64xf32>, vector<8x64xf32> -> vector<8x64xf32>
    %c64 = arith.constant 64 : index
    %c0_21 = arith.constant 0 : index
    %48 = vector.load %arg4[%c64, %c0_21] : memref<256x256xf32, #tpu.memory_space<vmem>>, vector<64x256xf32>
    %cst_22 = arith.constant dense<0.000000e+00> : vector<8x256xf32>
    %49 = tpu.matmul %47, %48, %cst_22 {dimension_numbers = #tpu.dot_dimension_numbers<[1], [0], [0], [1], [0, 0, 1, 1], [], []>} : vector<8x64xf32>, vector<64x256xf32>, vector<8x256xf32> -> vector<8x256xf32>
    %50 = arith.addf %31, %49 : vector<8x256xf32>
    %51 = vector.extract_strided_slice %7 {offsets = [0, 128], sizes = [8, 64], strides = [1, 1]} : vector<8x256xf32> to vector<8x64xf32>
    %52 = vector.extract_strided_slice %8 {offsets = [0, 128], sizes = [8, 64], strides = [1, 1]} : vector<8x256xf32> to vector<8x64xf32>
    %cst_23 = arith.constant dense<0.000000e+00> : vector<8x8xf32>
    %53 = tpu.matmul %51, %9, %cst_23 {dimension_numbers = #tpu.dot_dimension_numbers<[1], [1], [0], [0], [0, 0, 1, 0], [], []>} : vector<8x64xf32>, vector<8x64xf32>, vector<8x8xf32> -> vector<8x8xf32>
    %cst_24 = arith.constant dense<0xFF800000> : vector<8xf32>
    %54 = vector.multi_reduction <maximumf>, %53, %cst_24 [1] : vector<8x8xf32> to vector<8xf32>
    %55 = vector.shape_cast %54 : vector<8xf32> to vector<8x1xf32>
    %56 = vector.broadcast %55 : vector<8x1xf32> to vector<8x8xf32>
    %57 = arith.subf %53, %56 : vector<8x8xf32>
    %58 = math.exp %57 : vector<8x8xf32>
    %cst_25 = arith.constant dense<0.000000e+00> : vector<8xf32>
    %59 = vector.multi_reduction <add>, %58, %cst_25 [1] : vector<8x8xf32> to vector<8xf32>
    %60 = vector.shape_cast %59 : vector<8xf32> to vector<8x1xf32>
    %61 = tpu.reciprocal %60 : vector<8x1xf32> -> vector<8x1xf32>
    %cst_26 = arith.constant 6.250000e-02 : f32
    %62 = vector.broadcast %cst_26 : f32 to vector<8x1xf32>
    %63 = arith.mulf %61, %62 : vector<8x1xf32>
    %64 = vector.broadcast %63 : vector<8x1xf32> to vector<8x8xf32>
    %65 = arith.mulf %58, %64 : vector<8x8xf32>
    %cst_27 = arith.constant dense<0.000000e+00> : vector<8x64xf32>
    %66 = tpu.matmul %65, %52, %cst_27 {dimension_numbers = #tpu.dot_dimension_numbers<[1], [0], [0], [1], [0, 0, 1, 1], [], []>} : vector<8x8xf32>, vector<8x64xf32>, vector<8x64xf32> -> vector<8x64xf32>
    %c128 = arith.constant 128 : index
    %c0_28 = arith.constant 0 : index
    %67 = vector.load %arg4[%c128, %c0_28] : memref<256x256xf32, #tpu.memory_space<vmem>>, vector<64x256xf32>
    %cst_29 = arith.constant dense<0.000000e+00> : vector<8x256xf32>
    %68 = tpu.matmul %66, %67, %cst_29 {dimension_numbers = #tpu.dot_dimension_numbers<[1], [0], [0], [1], [0, 0, 1, 1], [], []>} : vector<8x64xf32>, vector<64x256xf32>, vector<8x256xf32> -> vector<8x256xf32>
    %69 = arith.addf %50, %68 : vector<8x256xf32>
    %70 = vector.extract_strided_slice %7 {offsets = [0, 192], sizes = [8, 64], strides = [1, 1]} : vector<8x256xf32> to vector<8x64xf32>
    %71 = vector.extract_strided_slice %8 {offsets = [0, 192], sizes = [8, 64], strides = [1, 1]} : vector<8x256xf32> to vector<8x64xf32>
    %cst_30 = arith.constant dense<0.000000e+00> : vector<8x8xf32>
    %72 = tpu.matmul %70, %9, %cst_30 {dimension_numbers = #tpu.dot_dimension_numbers<[1], [1], [0], [0], [0, 0, 1, 0], [], []>} : vector<8x64xf32>, vector<8x64xf32>, vector<8x8xf32> -> vector<8x8xf32>
    %cst_31 = arith.constant dense<0xFF800000> : vector<8xf32>
    %73 = vector.multi_reduction <maximumf>, %72, %cst_31 [1] : vector<8x8xf32> to vector<8xf32>
    %74 = vector.shape_cast %73 : vector<8xf32> to vector<8x1xf32>
    %75 = vector.broadcast %74 : vector<8x1xf32> to vector<8x8xf32>
    %76 = arith.subf %72, %75 : vector<8x8xf32>
    %77 = math.exp %76 : vector<8x8xf32>
    %cst_32 = arith.constant dense<0.000000e+00> : vector<8xf32>
    %78 = vector.multi_reduction <add>, %77, %cst_32 [1] : vector<8x8xf32> to vector<8xf32>
    %79 = vector.shape_cast %78 : vector<8xf32> to vector<8x1xf32>
    %80 = tpu.reciprocal %79 : vector<8x1xf32> -> vector<8x1xf32>
    %cst_33 = arith.constant 6.250000e-02 : f32
    %81 = vector.broadcast %cst_33 : f32 to vector<8x1xf32>
    %82 = arith.mulf %80, %81 : vector<8x1xf32>
    %83 = vector.broadcast %82 : vector<8x1xf32> to vector<8x8xf32>
    %84 = arith.mulf %77, %83 : vector<8x8xf32>
    %cst_34 = arith.constant dense<0.000000e+00> : vector<8x64xf32>
    %85 = tpu.matmul %84, %71, %cst_34 {dimension_numbers = #tpu.dot_dimension_numbers<[1], [0], [0], [1], [0, 0, 1, 1], [], []>} : vector<8x8xf32>, vector<8x64xf32>, vector<8x64xf32> -> vector<8x64xf32>
    %c192 = arith.constant 192 : index
    %c0_35 = arith.constant 0 : index
    %86 = vector.load %arg4[%c192, %c0_35] : memref<256x256xf32, #tpu.memory_space<vmem>>, vector<64x256xf32>
    %cst_36 = arith.constant dense<0.000000e+00> : vector<8x256xf32>
    %87 = tpu.matmul %85, %86, %cst_36 {dimension_numbers = #tpu.dot_dimension_numbers<[1], [0], [0], [1], [0, 0, 1, 1], [], []>} : vector<8x64xf32>, vector<64x256xf32>, vector<8x256xf32> -> vector<8x256xf32>
    %88 = arith.addf %69, %87 : vector<8x256xf32>
    %c0_37 = arith.constant 0 : index
    %c0_38 = arith.constant 0 : index
    %c0_39 = arith.constant 0 : index
    %89 = vector.load %arg6[%c0_37, %c0_38, %c0_39] : memref<1x8x256xf32, #tpu.memory_space<vmem>>, vector<1x8x256xf32>
    %90 = vector.shape_cast %89 : vector<1x8x256xf32> to vector<8x256xf32>
    %91 = vector.shape_cast %88 : vector<8x256xf32> to vector<1x8x256xf32>
    tpu.vector_store %arg6[%c0_37, %c0_38, %c0_39], %91 {strides = array<i32>} : memref<1x8x256xf32, #tpu.memory_space<vmem>>, vector<1x8x256xf32>,
    return
  }
  func.func @transform_0(%arg0: i32) -> (i32, i32, i32) {
    %c0_i32 = arith.constant 0 : i32
    %c0_i32_0 = arith.constant 0 : i32
    %c0_i32_1 = arith.constant 0 : i32
    return %arg0, %c0_i32, %c0_i32_0 : i32, i32, i32
  }
  func.func @transform_1(%arg0: i32) -> (i32, i32) {
    %c0_i32 = arith.constant 0 : i32
    %c0_i32_0 = arith.constant 0 : i32
    %c0_i32_1 = arith.constant 0 : i32
    return %c0_i32, %c0_i32_0 : i32, i32
  }
  func.func @transform_2(%arg0: i32) -> (i32, i32) {
    %c0_i32 = arith.constant 0 : i32
    %c0_i32_0 = arith.constant 0 : i32
    %c0_i32_1 = arith.constant 0 : i32
    return %c0_i32, %c0_i32_0 : i32, i32
  }
  func.func @transform_3(%arg0: i32) -> (i32, i32) {
    %c0_i32 = arith.constant 0 : i32
    %c0_i32_0 = arith.constant 0 : i32
    %c0_i32_1 = arith.constant 0 : i32
    return %c0_i32, %c0_i32_0 : i32, i32
  }
  func.func @transform_4(%arg0: i32) -> (i32, i32) {
    %c0_i32 = arith.constant 0 : i32
    %c0_i32_0 = arith.constant 0 : i32
    %c0_i32_1 = arith.constant 0 : i32
    return %c0_i32, %c0_i32_0 : i32, i32
  }
  func.func @transform_5(%arg0: i32) -> (i32, i32, i32) {
    %c0_i32 = arith.constant 0 : i32
    %c0_i32_0 = arith.constant 0 : i32
    %c0_i32_1 = arith.constant 0 : i32
    return %arg0, %c0_i32, %c0_i32_0 : i32, i32, i32
  }
}

</mosaic_0001>

<bundles_post_ra>
// kernel: multi_head_attention.1
= control target key start
LH: loop header
LB: loop body
LE: loop exit
PB: predicated region body
PF: predicated region fallthrough
CT: control target
= control target key end

     0   :  { %10 = vsyncpa [#allocation3], 0  ;;  %s3140_s0 = inlined_call_operand.vmem [shape: f32[2,8,256], index: 0, kind: input, shape index: {}]   ;;  %s3141_s1 = inlined_call_operand.vmem [shape: f32[256,576], index: 1, kind: input, shape index: {}]   ;;  %s3142_s2 = inlined_call_operand.vmem [shape: f32[1,576], index: 2, kind: input, shape index: {}]   ;;  %s3143_s3 = inlined_call_operand.vmem [shape: f32[256,256], index: 3, kind: input, shape index: {}]   ;;  %s3144_s4 = inlined_call_operand.vmem [shape: f32[1,256], index: 4, kind: input, shape index: {}]   ;;  %s3145_s5 = inlined_call_operand.hbm [shape: f32[2,8,256], index: 5, kind: output, shape index: {}]  }
   0x1   :  { %12 = vsyncpa [#allocation3 + $0x1], 0  ;;  %s2239_s18 = smov 0   ;;  %s2241_s19 = smov 0  }
   0x2   :  { %s2243_s20 = smov 0   ;;  %s2245_s21 = smov 0  }
   0x3 LB: > { %s2260_s22 = sadd.s32 4294967295, %s2203_s21   ;;  %s1729_s23 = sadd.s32 4294967294, %s2203_s21   ;;  %s2203_s21 = sphi %s2245_s21, %s3151_s21   ;;  %s2199_s20 = sphi %s2243_s20, %s3150_s20   ;;  %s2195_s19 = sphi %s2241_s19, %s3149_s19   ;;  %s2191_s18 = sphi %s2239_s18, %s3148_s18  }
   0x4   : > { %s2264_s24 = sadd.s32 1, %s2203_s21   ;;  %s135_s25 = sadd.s32 1, %s2199_s20 }
   0x5   : > { %s132_s26 = ssub.s32 %s2203_s21, %s2264_s24  ;;  %p145_p0 = scmp.ne.s32.totalorder %s2199_s20, %s2195_s19 }
   0x6   : > { %p133_p1 = scmp.eq.s32.totalorder %s132_s26, 0  ;;  %p146_p2 = scmp.eq.s32.totalorder %s2260_s22, 1 }
   0x7   : > { %p151_p3 = scmp.ne.s32.totalorder %s2195_s19, %s2191_s18  ;;  %p152_p4 = scmp.eq.s32.totalorder %s1729_s23, 1 }
   0x8   : > { %s2275_s27 = scalar_select %p133_p1, %s2199_s20, %s135_s25  }
   0x9   : > { %p2277_p5 = por %p146_p2, %p145_p0  ;;  %p2281_p6 = por %p152_p4, %p151_p3 }
   0xa   : > { %p1732_p7 = scmp.ge.s32.totalorder %s2203_s21, 1  ;;  %p190_p8 = scmp.lt.s32.totalorder %s2203_s21, 3 }
   0xc   : > { %p191_p9 = pnand %p1732_p7, %p190_p8 }
   0xd   : > { %v226_v0 = vld [vmem:[%s3141_s1 + $0x8] sm:$0xff] (!%p191_p9)  ;;  %v231_v1 = vld [vmem:[%s3141_s1 + $0x30] sm:$0xff] (!%p191_p9)  ;;  %v225_v2 = vld [vmem:[%s3141_s1] sm:$0xff] (!%p191_p9)  ;;  %p218_p10 = scmp.lt.s32.totalorder (!%p191_p9), %s2260_s22, 1  ;;  %vm2206_vm0 = vmmov (!%p191_p9), 0   ;;  %vm638_vm1 = vcmask (!%p191_p9), 523264  }
   0xe   : > { %194 = sbr.rel (%p191_p9) target bundleno = 2577 (0xa11), region = 40  ;;  %v1850_v3 = vpack.c.bf16 (!%p191_p9), %v231_v1, %v226_v0  ;;  %v230_v4 = vld [vmem:[%s3141_s1 + $0x28] sm:$0xff] (!%p191_p9)  ;;  %v236_v5 = vld [vmem:[%s3141_s1 + $0x58] sm:$0xff] (!%p191_p9)  ;;  %v241_v6 = vld [vmem:[%s3141_s1 + $0x80] sm:$0xff] (!%p191_p9)  ;;  %vm715_vm2 = vcmask (!%p191_p9), 64512   ;;  %s2207_s14 = smov (!%p191_p9), 64  }
   0xf   : > { %v1852_v7 = vpack.c.bf16 (!%p191_p9), %v230_v4, %v225_v2  ;;  %v1854_v8 = vpack.c.bf16 (!%p191_p9), %v241_v6, %v236_v5  ;;  %v235_v9 = vld [vmem:[%s3141_s1 + $0x50] sm:$0xff] (!%p191_p9)  ;;  %v240_v10 = vld [vmem:[%s3141_s1 + $0x78] sm:$0xff] (!%p191_p9)  ;;  %v246_v11 = vld [vmem:[%s3141_s1 + $0xa8] sm:$0xff] (!%p191_p9) }
  0x10   : > { %1851 = vmatprep.subr.bf16.mxu0 (!%p191_p9), %v1850_v3  ;;  %v251_v12 = vld [vmem:[%s3141_s1 + $0xd0] sm:$0xff] (!%p191_p9)  ;;  %v1856_v13 = vpack.c.bf16 (!%p191_p9), %v240_v10, %v235_v9  ;;  %v245_v15 = vld [vmem:[%s3141_s1 + $0xa0] sm:$0xff] (!%p191_p9)  ;;  %v250_v16 = vld [vmem:[%s3141_s1 + $0xc8] sm:$0xff] (!%p191_p9) }
  0x11   : > { %1853 = vmatpush1.bf16.msra.mxu0 (!%p191_p9), %v1852_v7  ;;  %v1858_v14 = vpack.c.bf16 (!%p191_p9), %v251_v12, %v246_v11  ;;  %v256_v17 = vld [vmem:[%s3141_s1 + $0xf8] sm:$0xff] (!%p191_p9)  ;;  %v261_v18 = vld [vmem:[%s3141_s1 + $0x120] sm:$0xff] (!%p191_p9)  ;;  %v1860_v19 = vpack.c.bf16 (!%p191_p9), %v250_v16, %v245_v15  ;;  %v255_v21 = vld [vmem:[%s3141_s1 + $0xf0] sm:$0xff] (!%p191_p9) }
  0x12   : > { %1855 = vmatprep.subr.bf16.mxu0 (!%p191_p9), %v1854_v8  ;;  %v1862_v20 = vpack.c.bf16 (!%p191_p9), %v261_v18, %v256_v17  ;;  %v260_v22 = vld [vmem:[%s3141_s1 + $0x118] sm:$0xff] (!%p191_p9)  ;;  %v266_v23 = vld [vmem:[%s3141_s1 + $0x148] sm:$0xff] (!%p191_p9)  ;;  %v271_v24 = vld [vmem:[%s3141_s1 + $0x170] sm:$0xff] (!%p191_p9) }
  0x13   : > { %v1864_v25 = vpack.c.bf16 (!%p191_p9), %v260_v22, %v255_v21  ;;  %v1866_v26 = vpack.c.bf16 (!%p191_p9), %v271_v24, %v266_v23  ;;  %v265_v27 = vld [vmem:[%s3141_s1 + $0x140] sm:$0xff] (!%p191_p9)  ;;  %v270_v28 = vld [vmem:[%s3141_s1 + $0x168] sm:$0xff] (!%p191_p9)  ;;  %v276_v29 = vld [vmem:[%s3141_s1 + $0x198] sm:$0xff] (!%p191_p9) }
  0x14   : > { %v281_v30 = vld [vmem:[%s3141_s1 + $0x1c0] sm:$0xff] (!%p191_p9)  ;;  %v1868_v31 = vpack.c.bf16 (!%p191_p9), %v270_v28, %v265_v27  ;;  %v275_v33 = vld [vmem:[%s3141_s1 + $0x190] sm:$0xff] (!%p191_p9)  ;;  %v280_v34 = vld [vmem:[%s3141_s1 + $0x1b8] sm:$0xff] (!%p191_p9) }
  0x15   : > { %1857 = vmatpush1.bf16.msra.mxu0 %v1856_v13  ;;  %s219_s9 = scalar_select %p218_p10, %s2260_s22, 1  ;;  %v1870_v32 = vpack.c.bf16 %v281_v30, %v276_v29  ;;  %v286_v35 = vld [vmem:[%s3141_s1 + $0x1e8] sm:$0xff]  ;;  %v291_v36 = vld [vmem:[%s3141_s1 + $0x210] sm:$0xff]  ;;  %v1872_v37 = vpack.c.bf16 %v280_v34, %v275_v33  ;;  %v285_v39 = vld [vmem:[%s3141_s1 + $0x1e0] sm:$0xff] }
  0x16   : > { %1859 = vmatprep.subr.bf16.mxu0 %v1858_v14  ;;  %v1874_v38 = vpack.c.bf16 %v291_v36, %v286_v35  ;;  %v290_v40 = vld [vmem:[%s3141_s1 + $0x208] sm:$0xff]  ;;  %v296_v42 = vld [vmem:[%s3141_s1 + $0x238] sm:$0xff]  ;;  %v301_v43 = vld [vmem:[%s3141_s1 + $0x260] sm:$0xff] }
  0x17   : > { %s1757_s23 = sshll.u32 %s219_s9, 4  ;;  %v1876_v44 = vpack.c.bf16 %v290_v40, %v285_v39  ;;  %v1878_v45 = vpack.c.bf16 %v301_v43, %v296_v42  ;;  %v295_v46 = vld [vmem:[%s3141_s1 + $0x230] sm:$0xff]  ;;  %v300_v47 = vld [vmem:[%s3141_s1 + $0x258] sm:$0xff]  ;;  %v306_v48 = vld [vmem:[%s3141_s1 + $0x288] sm:$0xff]  ;;  %s215_s9 = sand.u32 1, %s2195_s19  }
  0x18   : > { %s2370_s13 = scalar_lea.vmem %s3140_s0, %s1757_s23  ;;  %v311_v49 = vld [vmem:[%s3141_s1 + $0x2b0] sm:$0xff]  ;;  %v1880_v50 = vpack.c.bf16 %v300_v47, %v295_v46  ;;  %v305_v52 = vld [vmem:[%s3141_s1 + $0x280] sm:$0xff]  ;;  %v310_v53 = vld [vmem:[%s3141_s1 + $0x2a8] sm:$0xff]  ;;  %s1733_s12 = sshll.u32 %s215_s9, 4 }
  0x19   : > { %1861 = vmatpush1.bf16.msra.mxu0 %v1860_v19  ;;  %v2379_v41 = vld [vmem:[%s2370_s13 + $0x8] sm:$0xff]  ;;  %v1882_v51 = vpack.c.bf16 %v311_v49, %v306_v48  ;;  %v316_v54 = vld [vmem:[%s3141_s1 + $0x2d8] sm:$0xff]  ;;  %v321_v55 = vld [vmem:[%s3141_s1 + $0x300] sm:$0xff]  ;;  %v1884_v58 = vpack.c.bf16 %v310_v53, %v305_v52  ;;  %s217_s15 = scalar_lea.vmem [#allocation2], %s1733_s12  ;;  %s2208_s23 = smov [#allocation2]  }
  0x1a   : > { %1863 = vmatprep.subr.bf16.mxu0 %v1862_v20  ;;  %476 = vmatprep.mubr.f32.mxu0 %v2379_v41  ;;  %v315_v56 = vld [vmem:[%s3141_s1 + $0x2d0] sm:$0xff]  ;;  %v320_v57 = vld [vmem:[%s3141_s1 + $0x2f8] sm:$0xff]  ;;  %v326_v59 = vld [vmem:[%s3141_s1 + $0x328] sm:$0xff]  ;;  %v1886_v62 = vpack.c.bf16 %v321_v55, %v316_v54  ;;  %s1670_s16 = sshll.u32 %s217_s15, 4  ;;  %s2145_s30 = sshll.u32 %s2208_s23, 4  ;;  %s3100_s16 = int_to_ptr.vmem [resolvable:$true] %s1670_s16  ;;  %s2146_s30 = int_to_ptr.vmem [resolvable:$false] %s2145_s30 }
  0x1b   : > { %547 = vmatprep.mubr.f32.mxu1 %v2379_v41  ;;  %v331_v60 = vld [vmem:[%s3141_s1 + $0x350] sm:$0xff]  ;;  %v228_v61 = vld [vmem:[%s3141_s1 + $0x18] sm:$0xff]  ;;  %v233_v63 = vld [vmem:[%s3141_s1 + $0x40] sm:$0xff]  ;;  %v1888_v11 = vpack.c.bf16 %v320_v57, %v315_v56  ;;  %s2147_s6 = scalar_lea.vmem %s2146_s30, 512  ;;  %p2148_p0 = scmp.lt.s32.totalorder %s3100_s16, %s2146_s30 }
  0x1c   : > { %v227_v0 = vld [vmem:[%s3141_s1 + $0x10] sm:$0xff]  ;;  %v232_v1 = vld [vmem:[%s3141_s1 + $0x38] sm:$0xff]  ;;  %v1914_v2 = vpack.c.bf16 %v233_v63, %v228_v61  ;;  %v238_v4 = vld [vmem:[%s3141_s1 + $0x68] sm:$0xff]  ;;  %v1890_v12 = vpack.c.bf16 %v331_v60, %v326_v59 }
  0x1d   : > { %1865 = vmatpush1.bf16.msra.mxu0 %v1864_v25  ;;  %v1916_v3 = vpack.c.bf16 %v232_v1, %v227_v0  ;;  %v243_v5 = vld [vmem:[%s3141_s1 + $0x90] sm:$0xff]  ;;  %v237_v6 = vld [vmem:[%s3141_s1 + $0x60] sm:$0xff]  ;;  %v242_v8 = vld [vmem:[%s3141_s1 + $0x88] sm:$0xff] }
  0x1e   : > { %1867 = vmatprep.subr.bf16.mxu0 %v1866_v26  ;;  %v1918_v7 = vpack.c.bf16 %v243_v5, %v238_v4  ;;  %v248_v9 = vld [vmem:[%s3141_s1 + $0xb8] sm:$0xff]  ;;  %v253_v10 = vld [vmem:[%s3141_s1 + $0xe0] sm:$0xff]  ;;  %1915 = vmatprep.subr.bf16.mxu1 %v1914_v2  ;;  %v330_v14 = vld [vmem:[%s3141_s1 + $0x348] sm:$0xff]  ;;  %v1920_v16 = vpack.c.bf16 %v242_v8, %v237_v6 }
  0x1f   : > { %v325_v13 = vld [vmem:[%s3141_s1 + $0x320] sm:$0xff]  ;;  %v336_v15 = vld [vmem:[%s3141_s1 + $0x378] sm:$0xff]  ;;  %1917 = vmatpush1.bf16.msra.mxu1 %v1916_v3  ;;  %v1922_v18 = vpack.c.bf16 %v253_v10, %v248_v9  ;;  %v247_v19 = vld [vmem:[%s3141_s1 + $0xb0] sm:$0xff] }
  0x20   : > { %v341_v17 = vld [vmem:[%s3141_s1 + $0x3a0] sm:$0xff]  ;;  %1919 = vmatprep.subr.bf16.mxu1 %v1918_v7  ;;  %v252_v20 = vld [vmem:[%s3141_s1 + $0xd8] sm:$0xff]  ;;  %v258_v21 = vld [vmem:[%s3141_s1 + $0x108] sm:$0xff]  ;;  %v1892_v23 = vpack.c.bf16 %v330_v14, %v325_v13 }
  0x21   : > { %1869 = vmatpush1.bf16.msra.mxu0 %v1868_v31  ;;  %v263_v22 = vld [vmem:[%s3141_s1 + $0x130] sm:$0xff]  ;;  %v1894_v24 = vpack.c.bf16 %v341_v17, %v336_v15  ;;  %v340_v26 = vld [vmem:[%s3141_s1 + $0x398] sm:$0xff]  ;;  %v346_v27 = vld [vmem:[%s3141_s1 + $0x3c8] sm:$0xff]  ;;  %v1924_v28 = vpack.c.bf16 %v252_v20, %v247_v19 }
  0x22   : > { %1871 = vmatprep.subr.bf16.mxu0 %v1870_v32  ;;  %v335_v25 = vld [vmem:[%s3141_s1 + $0x370] sm:$0xff]  ;;  %v1926_v30 = vpack.c.bf16 %v263_v22, %v258_v21  ;;  %v257_v31 = vld [vmem:[%s3141_s1 + $0x100] sm:$0xff]  ;;  %v262_v32 = vld [vmem:[%s3141_s1 + $0x128] sm:$0xff] }
  0x23   : > { %1921 = vmatpush1.bf16.msra.mxu1 %v1920_v16  ;;  %v351_v29 = vld [vmem:[%s3141_s1 + $0x3f0] sm:$0xff]  ;;  %v268_v33 = vld [vmem:[%s3141_s1 + $0x158] sm:$0xff]  ;;  %v273_v34 = vld [vmem:[%s3141_s1 + $0x180] sm:$0xff]  ;;  %v1896_v35 = vpack.c.bf16 %v340_v26, %v335_v25  ;;  %v1928_v40 = vpack.c.bf16 %v262_v32, %v257_v31 }
  0x24   : > { %1923 = vmatprep.subr.bf16.mxu1 %v1922_v18  ;;  %v1898_v36 = vpack.c.bf16 %v351_v29, %v346_v27  ;;  %v356_v39 = vld [vmem:[%s3141_s1 + $0x418] sm:$0xff]  ;;  %v361_v42 = vld [vmem:[%s3141_s1 + $0x440] sm:$0xff]  ;;  %v1930_v43 = vpack.c.bf16 %v273_v34, %v268_v33  ;;  %v278_v46 = vld [vmem:[%s3141_s1 + $0x1a8] sm:$0xff] }
  0x25   : > { %1873 = vmatpush1.bf16.msra.mxu0 %v1872_v37  ;;  %v345_v37 = vld [vmem:[%s3141_s1 + $0x3c0] sm:$0xff]  ;;  %v283_v47 = vld [vmem:[%s3141_s1 + $0x1d0] sm:$0xff]  ;;  %v1902_v49 = vpack.c.bf16 %v361_v42, %v356_v39  ;;  %v366_v52 = vld [vmem:[%s3141_s1 + $0x468] sm:$0xff] }
  0x26   : > { %1875 = vmatprep.subr.bf16.mxu0 %v1874_v38  ;;  %v350_v38 = vld [vmem:[%s3141_s1 + $0x3e8] sm:$0xff]  ;;  %v371_v54 = vld [vmem:[%s3141_s1 + $0x490] sm:$0xff]  ;;  %v1934_v55 = vpack.c.bf16 %v283_v47, %v278_v46  ;;  %v277_v56 = vld [vmem:[%s3141_s1 + $0x1a0] sm:$0xff] }
  0x27   : > { %1925 = vmatpush1.bf16.msra.mxu1 %v1924_v28  ;;  %v1900_v48 = vpack.c.bf16 %v350_v38, %v345_v37  ;;  %v282_v57 = vld [vmem:[%s3141_s1 + $0x1c8] sm:$0xff]  ;;  %v293_v59 = vld [vmem:[%s3141_s1 + $0x220] sm:$0xff]  ;;  %v1906_v61 = vpack.c.bf16 %v371_v54, %v366_v52  ;;  %v376_v0 = vld [vmem:[%s3141_s1 + $0x4b8] sm:$0xff] }
  0x28   : > { %1927 = vmatprep.subr.bf16.mxu1 %v1926_v30  ;;  %v370_v63 = vld [vmem:[%s3141_s1 + $0x488] sm:$0xff]  ;;  %v1936_v1 = vpack.c.bf16 %v282_v57, %v277_v56  ;;  %v381_v2 = vld [vmem:[%s3141_s1 + $0x4e0] sm:$0xff]  ;;  %v287_v4 = vld [vmem:[%s3141_s1 + $0x1f0] sm:$0xff] }
  0x29   : > { %1877 = vmatpush1.bf16.msra.mxu0 %v1876_v44  ;;  %v267_v44 = vld [vmem:[%s3141_s1 + $0x150] sm:$0xff]  ;;  %v292_v5 = vld [vmem:[%s3141_s1 + $0x218] sm:$0xff]  ;;  %v298_v6 = vld [vmem:[%s3141_s1 + $0x248] sm:$0xff]  ;;  %v1910_v9 = vpack.c.bf16 %v381_v2, %v376_v0 }
  0x2a   : > { %1879 = vmatprep.subr.bf16.mxu0 %v1878_v45  ;;  %v272_v45 = vld [vmem:[%s3141_s1 + $0x178] sm:$0xff]  ;;  %v303_v7 = vld [vmem:[%s3141_s1 + $0x270] sm:$0xff]  ;;  %v1940_v13 = vpack.c.bf16 %v292_v5, %v287_v4  ;;  %v314_v14 = vld [vmem:[%s3141_s1 + $0x2c8] sm:$0xff] }
  0x2b   : > { %1929 = vmatpush1.bf16.msra.mxu1 %v1928_v40  ;;  %v1932_v53 = vpack.c.bf16 %v272_v45, %v267_v44  ;;  %v375_v10 = vld [vmem:[%s3141_s1 + $0x4b0] sm:$0xff]  ;;  %v1942_v15 = vpack.c.bf16 %v303_v7, %v298_v6  ;;  %v297_v16 = vld [vmem:[%s3141_s1 + $0x240] sm:$0xff]  ;;  %v302_v17 = vld [vmem:[%s3141_s1 + $0x268] sm:$0xff] }
  0x2c   : > { %1931 = vmatprep.subr.bf16.mxu1 %v1930_v43  ;;  %v229_v20 = vld [vmem:[%s3141_s1 + $0x20] sm:$0xff]  ;;  %v234_v21 = vld [vmem:[%s3141_s1 + $0x48] sm:$0xff]  ;;  %v1944_v22 = vpack.c.bf16 %v302_v17, %v297_v16  ;;  %v239_v28 = vld [vmem:[%s3141_s1 + $0x70] sm:$0xff] }
  0x2d   : > { %1881 = vmatpush1.bf16.msra.mxu0 %v1880_v50  ;;  %v355_v50 = vld [vmem:[%s3141_s1 + $0x410] sm:$0xff]  ;;  %v2606_v25 = vld [vmem:[%s2370_s13] sm:$0xff]  ;;  %v1980_v26 = vpack.c.bf16 %v234_v21, %v229_v20  ;;  %v244_v29 = vld [vmem:[%s3141_s1 + $0x98] sm:$0xff] }
  0x2e   : > { %1883 = vmatprep.subr.bf16.mxu0 %v1882_v51  ;;  %v360_v51 = vld [vmem:[%s3141_s1 + $0x438] sm:$0xff]  ;;  %v329_v30 = vld [vmem:[%s3141_s1 + $0x340] sm:$0xff]  ;;  %v334_v31 = vld [vmem:[%s3141_s1 + $0x368] sm:$0xff]  ;;  %v1984_v32 = vpack.c.bf16 %v244_v29, %v239_v28 }
  0x2f   : > { %v1904_v60 = vpack.c.bf16 %v360_v51, %v355_v50  ;;  %1933 = vmatpush1.bf16.msra.mxu1 %v1932_v53  ;;  %v1986_v33 = vpack.c.bf16 %v334_v31, %v329_v30  ;;  %v249_v34 = vld [vmem:[%s3141_s1 + $0xc0] sm:$0xff]  ;;  %v344_v37 = vld [vmem:[%s3141_s1 + $0x3b8] sm:$0xff]  ;;  %v259_v39 = vld [vmem:[%s3141_s1 + $0x110] sm:$0xff] }
  0x30   : > { %1935 = vmatprep.subr.bf16.mxu1 %v1934_v55  ;;  %v264_v40 = vld [vmem:[%s3141_s1 + $0x138] sm:$0xff]  ;;  %v349_v42 = vld [vmem:[%s3141_s1 + $0x3e0] sm:$0xff]  ;;  %v354_v43 = vld [vmem:[%s3141_s1 + $0x408] sm:$0xff] }
  0x31   : > { %1885 = vmatpush1.bf16.msra.mxu0 %v1884_v58  ;;  %v288_v58 = vld [vmem:[%s3141_s1 + $0x1f8] sm:$0xff]  ;;  %v1992_v44 = vpack.c.bf16 %v264_v40, %v259_v39  ;;  %v1994_v45 = vpack.c.bf16 %v354_v43, %v349_v42  ;;  %v269_v46 = vld [vmem:[%s3141_s1 + $0x160] sm:$0xff]  ;;  %v274_v47 = vld [vmem:[%s3141_s1 + $0x188] sm:$0xff] }
  0x32   : > { %1887 = vmatprep.subr.bf16.mxu0 %v1886_v62  ;;  %v365_v62 = vld [vmem:[%s3141_s1 + $0x460] sm:$0xff]  ;;  %v1938_v3 = vpack.c.bf16 %v293_v59, %v288_v58  ;;  %v1996_v50 = vpack.c.bf16 %v274_v47, %v269_v46  ;;  %v279_v52 = vld [vmem:[%s3141_s1 + $0x1b0] sm:$0xff]  ;;  %v284_v53 = vld [vmem:[%s3141_s1 + $0x1d8] sm:$0xff] }
  0x33   : > { %v1908_v8 = vpack.c.bf16 %v370_v63, %v365_v62  ;;  %1937 = vmatpush1.bf16.msra.mxu1 %v1936_v1  ;;  %v369_v54 = vld [vmem:[%s3141_s1 + $0x480] sm:$0xff]  ;;  %v374_v55 = vld [vmem:[%s3141_s1 + $0x4a8] sm:$0xff]  ;;  %v2000_v56 = vpack.c.bf16 %v284_v53, %v279_v52  ;;  %v299_v0 = vld [vmem:[%s3141_s1 + $0x250] sm:$0xff]  ;;  %v2205_v52 = vmov 0.0  }
  0x34   : > { %1939 = vmatprep.subr.bf16.mxu1 %v1938_v3  ;;  %v2002_v57 = vpack.c.bf16 %v374_v55, %v369_v54  ;;  %v289_v58 = vld [vmem:[%s3141_s1 + $0x200] sm:$0xff]  ;;  %v294_v59 = vld [vmem:[%s3141_s1 + $0x228] sm:$0xff]  ;;  %v304_v1 = vld [vmem:[%s3141_s1 + $0x278] sm:$0xff]  ;;  %v387_v55 = vlaneseq }
  0x35   : > { %1889 = vmatpush1.bf16.msra.mxu0 %v1888_v11  ;;  %v380_v11 = vld [vmem:[%s3141_s1 + $0x4d8] sm:$0xff]  ;;  %v2004_v62 = vpack.c.bf16 %v294_v59, %v289_v58  ;;  %v2008_v2 = vpack.c.bf16 %v304_v1, %v299_v0  ;;  %v313_v4 = vld [vmem:[%s3141_s1 + $0x2c0] sm:$0xff]  ;;  %v307_v6 = vld [vmem:[%s3141_s1 + $0x290] sm:$0xff] }
  0x36   : > { %1891 = vmatprep.subr.bf16.mxu0 %v1890_v12  ;;  %v309_v12 = vld [vmem:[%s3141_s1 + $0x2a0] sm:$0xff]  ;;  %v1912_v18 = vpack.c.bf16 %v380_v11, %v375_v10  ;;  %v308_v3 = vld [vmem:[%s3141_s1 + $0x298] sm:$0xff]  ;;  %v323_v10 = vld [vmem:[%s3141_s1 + $0x310] sm:$0xff] }
  0x37   : > { %v1978_v19 = vpack.c.bf16 %v314_v14, %v309_v12  ;;  %1941 = vmatpush1.bf16.msra.mxu1 %v1940_v13  ;;  %v1946_v5 = vpack.c.bf16 %v313_v4, %v308_v3  ;;  %v312_v7 = vld [vmem:[%s3141_s1 + $0x2b8] sm:$0xff]  ;;  %v317_v12 = vld [vmem:[%s3141_s1 + $0x2e0] sm:$0xff]  ;;  %v322_v13 = vld [vmem:[%s3141_s1 + $0x308] sm:$0xff] }
  0x38   : > { %1943 = vmatprep.subr.bf16.mxu1 %v1942_v15  ;;  %v328_v14 = vld [vmem:[%s3141_s1 + $0x338] sm:$0xff]  ;;  %v1952_v15 = vpack.c.bf16 %v322_v13, %v317_v12  ;;  %v333_v16 = vld [vmem:[%s3141_s1 + $0x360] sm:$0xff]  ;;  %v327_v17 = vld [vmem:[%s3141_s1 + $0x330] sm:$0xff] }
  0x39   : > { %1893 = vmatpush1.bf16.msra.mxu0 %v1892_v23  ;;  %v319_v23 = vld [vmem:[%s3141_s1 + $0x2f0] sm:$0xff]  ;;  %v338_v20 = vld [vmem:[%s3141_s1 + $0x388] sm:$0xff]  ;;  %v353_v28 = vld [vmem:[%s3141_s1 + $0x400] sm:$0xff] }
  0x3a   : > { %1895 = vmatprep.subr.bf16.mxu0 %v1894_v24  ;;  %v324_v24 = vld [vmem:[%s3141_s1 + $0x318] sm:$0xff]  ;;  %v343_v21 = vld [vmem:[%s3141_s1 + $0x3b0] sm:$0xff]  ;;  %v373_v39 = vld [vmem:[%s3141_s1 + $0x4a0] sm:$0xff] }
  0x3b   : > { %v1982_v27 = vpack.c.bf16 %v324_v24, %v319_v23  ;;  %1945 = vmatpush1.bf16.msra.mxu1 %v1944_v22  ;;  %v1958_v23 = vpack.c.bf16 %v343_v21, %v338_v20  ;;  %v337_v24 = vld [vmem:[%s3141_s1 + $0x380] sm:$0xff]  ;;  %v347_v31 = vld [vmem:[%s3141_s1 + $0x3d0] sm:$0xff]  ;;  %v806_v21 = vld [vmem:[%s3143_s3 + $0x28] sm:$0xff] }
  0x3c   : > { %1947 = vmatprep.subr.bf16.mxu1 %v1946_v5  ;;  %v367_v43 = vld [vmem:[%s3141_s1 + $0x470] sm:$0xff]  ;;  %v2798_v58 = vld [vmem:[%s3142_s2] sm:$0x1f] }
  0x3d   : > { %1897 = vmatpush1.bf16.msra.mxu0 %v1896_v35  ;;  %v254_v35 = vld [vmem:[%s3141_s1 + $0xe8] sm:$0xff]  ;;  %v383_v46 = vld [vmem:[%s3141_s1 + $0x4f0] sm:$0xff] }
  0x3e   : > { %1899 = vmatprep.subr.bf16.mxu0 %v1898_v36  ;;  %v339_v36 = vld [vmem:[%s3141_s1 + $0x390] sm:$0xff] }
  0x3f   : > { %v1990_v38 = vpack.c.bf16 %v344_v37, %v339_v36  ;;  %v357_v37 = vld [vmem:[%s3141_s1 + $0x420] sm:$0xff]  ;;  %v803_v20 = vld [vmem:[%s3143_s3 + $0x10] sm:$0xff] }
  0x41   : > { %1901 = vmatpush1.bf16.msra.mxu0 %v1900_v48  ;;  %v359_v48 = vld [vmem:[%s3141_s1 + $0x430] sm:$0xff] }
  0x42   : > { %1903 = vmatprep.subr.bf16.mxu0 %v1902_v49  ;;  %v364_v49 = vld [vmem:[%s3141_s1 + $0x458] sm:$0xff] }
  0x43   : > { %v1998_v51 = vpack.c.bf16 %v364_v49, %v359_v48  ;;  %v377_v49 = vld [vmem:[%s3141_s1 + $0x4c0] sm:$0xff] }
  0x45   : > { %1905 = vmatpush1.bf16.msra.mxu0 %v1904_v60  ;;  %v379_v60 = vld [vmem:[%s3141_s1 + $0x4d0] sm:$0xff] }
  0x46   : > { %1907 = vmatprep.subr.bf16.mxu0 %v1906_v61  ;;  %v384_v61 = vld [vmem:[%s3141_s1 + $0x4f8] sm:$0xff] }
  0x47   : > { %v2006_v63 = vpack.c.bf16 %v384_v61, %v379_v60 }
  0x49   : > { %1909 = vmatpush1.bf16.msra.mxu0 %v1908_v8  ;;  %v1948_v8 = vpack.c.bf16 %v312_v7, %v307_v6 }
  0x4a   : > { %1911 = vmatprep.subr.bf16.mxu0 %v1910_v9  ;;  %v318_v9 = vld [vmem:[%s3141_s1 + $0x2e8] sm:$0xff] }
  0x4b   : > { %1949 = vmatpush1.bf16.msra.mxu1 %v1948_v8  ;;  %v1950_v11 = vpack.c.bf16 %v323_v10, %v318_v9 }
  0x4d   : > { %1913 = vmatpush1.bf16.msra.mxu0 %v1912_v18  ;;  %v332_v18 = vld [vmem:[%s3141_s1 + $0x358] sm:$0xff]  ;;  %1951 = vmatprep.subr.bf16.mxu1 %v1950_v11 }
  0x4e   : > { %1979 = vmatprep.subr.bf16.mxu0 %v1978_v19  ;;  %v1954_v19 = vpack.c.bf16 %v333_v16, %v328_v14  ;;  %v1956_v22 = vpack.c.bf16 %v332_v18, %v327_v17  ;;  %v802_v16 = vld [vmem:[%s3143_s3 + $0x8] sm:$0xff]  ;;  %v804_v17 = vld [vmem:[%s3143_s3 + $0x18] sm:$0xff]  ;;  %v801_v18 = vld [vmem:[%s3143_s3] sm:$0xff] }
  0x4f   : > { %1953 = vmatpush1.bf16.msra.mxu1 %v1952_v15 }
  0x50   : > { %477 = vmatmul.mubr.f32.vlgmr.msra.gmra.mrb[0].mxu0 %v2606_v25  ;;  %1955 = vmatprep.subr.bf16.mxu1 %v1954_v19  ;;  %v2010_v19 = vpack.c.bf16 %v804_v17, %v802_v16 }
  0x51   : > { %1981 = vmatpush3.bf16.msra.mxu0 %v1980_v26  ;;  %618 = vmatprep.mubr.f32.mxu0 %v2379_v41  ;;  %v1988_v41 = vpack.c.bf16 %v254_v35, %v249_v34  ;;  %v342_v26 = vld [vmem:[%s3141_s1 + $0x3a8] sm:$0xff]  ;;  %v363_v34 = vld [vmem:[%s3141_s1 + $0x450] sm:$0xff] }
  0x52   : > { %1983 = vmatprep.subr.bf16.mxu0 %v1982_v27  ;;  %v348_v27 = vld [vmem:[%s3141_s1 + $0x3d8] sm:$0xff]  ;;  %v1960_v29 = vpack.c.bf16 %v342_v26, %v337_v24  ;;  %v805_v26 = vld [vmem:[%s3143_s3 + $0x20] sm:$0xff] }
  0x53   : > { %1957 = vmatpush1.bf16.msra.mxu1 %v1956_v22  ;;  %v1962_v30 = vpack.c.bf16 %v353_v28, %v348_v27  ;;  %v808_v22 = vld [vmem:[%s3143_s3 + $0x38] sm:$0xff]  ;;  %v807_v27 = vld [vmem:[%s3143_s3 + $0x30] sm:$0xff]  ;;  %v810_v28 = vld [vmem:[%s3143_s3 + $0x48] sm:$0xff] }
  0x54   : > { %1959 = vmatprep.subr.bf16.mxu1 %v1958_v23  ;;  %v2012_v23 = vpack.c.bf16 %v803_v20, %v801_v18  ;;  %v2014_v24 = vpack.c.bf16 %v808_v22, %v806_v21 }
  0x55   : > { %1985 = vmatpush3.bf16.msra.mxu0 %v1984_v32  ;;  %v352_v32 = vld [vmem:[%s3141_s1 + $0x3f8] sm:$0xff] }
  0x56   : > { %1987 = vmatprep.subr.bf16.mxu0 %v1986_v33  ;;  %v358_v33 = vld [vmem:[%s3141_s1 + $0x428] sm:$0xff]  ;;  %v1964_v35 = vpack.c.bf16 %v352_v32, %v347_v31  ;;  %v809_v32 = vld [vmem:[%s3143_s3 + $0x40] sm:$0xff] }
  0x57   : > { %1961 = vmatpush1.bf16.msra.mxu1 %v1960_v29  ;;  %v1966_v36 = vpack.c.bf16 %v363_v34, %v358_v33  ;;  %v812_v29 = vld [vmem:[%s3143_s3 + $0x58] sm:$0xff]  ;;  %v811_v33 = vld [vmem:[%s3143_s3 + $0x50] sm:$0xff]  ;;  %v814_v34 = vld [vmem:[%s3143_s3 + $0x68] sm:$0xff] }
  0x58   : > { %1963 = vmatprep.subr.bf16.mxu1 %v1962_v30  ;;  %v2016_v30 = vpack.c.bf16 %v807_v27, %v805_v26  ;;  %v2018_v31 = vpack.c.bf16 %v812_v29, %v810_v28 }
  0x59   : > { %1989 = vmatpush3.bf16.msra.mxu0 %v1988_v41  ;;  %v362_v41 = vld [vmem:[%s3141_s1 + $0x448] sm:$0xff] }
  0x5a   : > { %1991 = vmatprep.subr.bf16.mxu0 %v1990_v38  ;;  %v368_v38 = vld [vmem:[%s3141_s1 + $0x478] sm:$0xff]  ;;  %v1968_v40 = vpack.c.bf16 %v362_v41, %v357_v37  ;;  %v813_v41 = vld [vmem:[%s3143_s3 + $0x60] sm:$0xff] }
  0x5b   : > { %1965 = vmatpush1.bf16.msra.mxu1 %v1964_v35  ;;  %v1970_v42 = vpack.c.bf16 %v373_v39, %v368_v38  ;;  %v816_v35 = vld [vmem:[%s3143_s3 + $0x78] sm:$0xff]  ;;  %v815_v38 = vld [vmem:[%s3143_s3 + $0x70] sm:$0xff] }
  0x5c   : > { %1967 = vmatprep.subr.bf16.mxu1 %v1966_v36  ;;  %v2020_v36 = vpack.c.bf16 %v811_v33, %v809_v32  ;;  %v2022_v37 = vpack.c.bf16 %v816_v35, %v814_v34  ;;  %v2024_v39 = vpack.c.bf16 %v815_v38, %v813_v41  ;;  %v1057_v32 = vld [vmem:[%s3143_s3 + $0x88] sm:$0xff]  ;;  %v1059_v33 = vld [vmem:[%s3143_s3 + $0x98] sm:$0xff]  ;;  %v1056_v34 = vld [vmem:[%s3143_s3 + $0x80] sm:$0xff] }
  0x5d   : > { %1993 = vmatpush3.bf16.msra.mxu0 %v1992_v44  ;;  %v372_v44 = vld [vmem:[%s3141_s1 + $0x498] sm:$0xff]  ;;  %v2026_v35 = vpack.c.bf16 %v1059_v33, %v1057_v32 }
  0x5e   : > { %1995 = vmatprep.subr.bf16.mxu0 %v1994_v45  ;;  %v378_v45 = vld [vmem:[%s3141_s1 + $0x4c8] sm:$0xff]  ;;  %v1972_v47 = vpack.c.bf16 %v372_v44, %v367_v43  ;;  %v1063_v41 = vld [vmem:[%s3143_s3 + $0xb8] sm:$0xff] }
  0x5f   : > { %1969 = vmatpush1.bf16.msra.mxu1 %v1968_v40  ;;  %v1974_v48 = vpack.c.bf16 %v383_v46, %v378_v45 }
  0x60   : > { %1971 = vmatprep.subr.bf16.mxu1 %v1970_v42 }
  0x61   : > { %1997 = vmatpush3.bf16.msra.mxu0 %v1996_v50  ;;  %v382_v50 = vld [vmem:[%s3141_s1 + $0x4e8] sm:$0xff] }
  0x62   : > { %1999 = vmatprep.subr.bf16.mxu0 %v1998_v51  ;;  %v1976_v51 = vpack.c.bf16 %v382_v50, %v377_v49 }
  0x63   : > { %1973 = vmatpush1.bf16.msra.mxu1 %v1972_v47 }
  0x64   : > { %1975 = vmatprep.subr.bf16.mxu1 %v1974_v48 }
  0x65   : > { %2001 = vmatpush3.bf16.msra.mxu0 %v2000_v56  ;;  %v2792_v56 = vshrl.u32 %v387_v55, 7 }
  0x66   : > { %2003 = vmatprep.subr.bf16.mxu0 %v2002_v57 }
  0x67   : > { %1977 = vmatpush1.bf16.msra.mxu1 %v1976_v51  ;;  %v405_v57 = vsub.s32 4, %v2792_v56  ;;  %v389_v59 = vsub.s32 0, %v2792_v56  ;;  %v397_v3 = vsub.s32 2, %v2792_v56  ;;  %v393_v46 = vsub.s32 1, %v2792_v56 }
  0x68   : > { %1810 = vmatprep.subr.mxu1 %v2205_v52  ;;  %v401_v47 = vsub.s32 3, %v2792_v56 }
  0x69   : > { %2005 = vmatpush3.bf16.msra.mxu0 %v2004_v62  ;;  %v406_v61 = vrot.slane %v2798_v58, %v405_v57  ;;  %v390_v0 = vrot.slane %v2798_v58, %v389_v59  ;;  %v398_v4 = vrot.slane %v2798_v58, %v397_v3  ;;  %v394_v48 = vrot.slane %v2798_v58, %v393_v46 }
  0x6a   : > { %2007 = vmatprep.subr.bf16.mxu0 %v2006_v63  ;;  %548 = vmatmul.mubr.f32.vlgmr.msra.gmra.mrb[0].mxu1 %v2606_v25  ;;  %v402_v49 = vrot.slane %v2798_v58, %v401_v47 }
  0x6b   : > { %1812 = vmatprep.mubr.msk.f32.mxu1 %vm2206_vm0, %v2205_v52 }
  0x6d   : > { %2009 = vmatpush3.bf16.msra.mxu0 %v2008_v2 }
  0x6e   : > { %2011 = vmatprep.subr.bf16.mxu0 %v2010_v19 }
  0x70   : > { %619 = vmatmul.mubr.f32.vlgmr.msra.gmra.mrb[2].mxu0 %v2606_v25 }
  0x71   : > { %884 = vmatprep.mubr.f32.mxu0 %v2205_v52  ;;  %2013 = vmatpush1.bf16.msra.mxu0 %v2012_v23 }
  0x72   : > { %2015 = vmatprep.subr.bf16.mxu0 %v2014_v24 }
  0x75   : > { %2017 = vmatpush1.bf16.msra.mxu0 %v2016_v30 }
  0x76   : > { %2019 = vmatprep.subr.bf16.mxu0 %v2018_v31 }
  0x79   : > { %2021 = vmatpush1.bf16.msra.mxu0 %v2020_v36  ;;  %v1058_v36 = vld [vmem:[%s3143_s3 + $0x90] sm:$0xff] }
  0x7a   : > { %2023 = vmatprep.subr.bf16.mxu0 %v2022_v37  ;;  %v1061_v37 = vld [vmem:[%s3143_s3 + $0xa8] sm:$0xff]  ;;  %v2028_v38 = vpack.c.bf16 %v1058_v36, %v1056_v34  ;;  %v1561_v34 = vld [vmem:[%s3143_s3 + $0x180] sm:$0xff] }
  0x7b   : > { %v1566_v36 = vld [vmem:[%s3143_s3 + $0x1a8] sm:$0xff] }
  0x7d   : > { %2025 = vmatpush1.bf16.msra.mxu0 %v2024_v39  ;;  %v2030_v39 = vpack.c.bf16 %v1063_v41, %v1061_v37  ;;  %v1568_v37 = vld [vmem:[%s3143_s3 + $0x1b8] sm:$0xff] }
  0x7e   : > { %1830 = vmatprep.subr.mxu0 %v2205_v52 }
 0x123   : > { %v478_v53 = vpop.f32.mrb[0].mxu0 }
 0x124   : > { %v2790_v54 = vpop.f32.mrb[1].mxu0  ;;  %v479_v2 = vadd.f32 %v478_v53, %v390_v0 }
 0x125   : > { %v481_v53 = vadd.f32 %v2790_v54, %v394_v48  ;;  %v1064_v48 = vld [vmem:[%s3143_s3 + $0xc0] sm:$0xff] }
 0x13d   : > { %v549_v5 = vpop.f32.mrb[0].mxu1 }
 0x13e   : > { %v2815_v6 = vadd.f32 %v549_v5, %v398_v4  ;;  %v2817_v7 = vpop.f32.mrb[1].mxu1 }
 0x13f   : > { %v2896_v55 = vadd.f32 %v2817_v7, %v402_v49  ;;  %v1066_v49 = vld [vmem:[%s3143_s3 + $0xd0] sm:$0xff] }
 0x143   : > { %v1791_v60 = vpop.f32.mrb[2].mxu0 }
 0x144   : > { %v1792_v62 = vpop.f32.mrb[3].mxu0 }
 0x145   : > { %v1793_v63 = vadd.f32 %v1792_v62, %v1791_v60 }
 0x147   : > { %v2805_v1 = vadd.f32 %v1793_v63, %v406_v61 }
 0x149   : > { %1811 = vmatpush3.xpose.msk.msra.mxu1 %vm638_vm1, %v2805_v1 }
 0x14a   : > { %1815 = vmatprep.subr.mxu1 %v2205_v52 }
 0x14c   : > { %1813 = vmatmul.mubr.msk.f32.vlgmr.msra.gmra.mrb[2].mxu1 %vm638_vm1, %v479_v2 }
 0x14d   : > { %1817 = vmatprep.mubr.msk.f32.mxu1 %vm2206_vm0, %v2205_v52  ;;  %1816 = vmatpush3.msra.mxu1 %v2815_v6 }
 0x14e   : > { %1820 = vmatprep.subr.mxu1 %v2205_v52 }
 0x21f   : > { %v711_v8 = vpop.f32.mrb[2].mxu1 }
 0x220   : > { %v1814_v9 = vpop.f32.mrb[3].mxu1  ;;  %v716_v10 = vsel %vm715_vm2, %v711_v8, -inf }
 0x221   : > { %717 = vmax.xlane.f32.xlu0 %v716_v10 }
 0x2ae   : > { %v718_v11 = vpop.xlane.xlu0 %717 }
 0x2af   : > { %v719_v12 = vsub.f32 %v711_v8, %v718_v11 }
 0x2b1   : > { %v720_v13 = vmul.f32 1.442695, %v719_v12 }
 0x2b3   : > { %2124 = vpow2.f32 %v720_v13 }
 0x2bd   : > { %v2125_v14 = vpop.eup %2124 }
 0x2be   : > { %v722_v15 = vsel %vm715_vm2, %v2125_v14, 0.0 }
 0x2bf   : > { %723 = vadd.xlane.f32.xlu0 %v722_v15 }
 0x2d5   : > { %893 = vrot.lane.b32.xlu0 %v479_v2, %s2207_s14 }
 0x34c   : > { %v724_v40 = vpop.xlane.xlu0 %723 }
 0x34d   : > { %2126 = vrcp.f32 %v724_v40  ;;  %v1060_v40 = vld [vmem:[%s3143_s3 + $0xa0] sm:$0xff] }
 0x350   : > { %v894_v45 = vpop.permute.xlu0 %893 }
 0x357   : > { %v2127_v42 = vpop.eup %2126 }
 0x358   : > { %v726_v43 = vmul.f32 0.0625, %v2127_v42  ;;  %v1062_v42 = vld [vmem:[%s3143_s3 + $0xb0] sm:$0xff] }
 0x35a   : > { %v727_v44 = vmul.f32 %v2125_v14, %v726_v43  ;;  %v1065_v43 = vld [vmem:[%s3143_s3 + $0xc8] sm:$0xff] }
 0x35c   : > { %1818 = vmatmul.mubr.msk.f32.vlgmr.msra.gmra.mrb[4].mxu1 %vm715_vm2, %v727_v44  ;;  %v1067_v44 = vld [vmem:[%s3143_s3 + $0xd8] sm:$0xff] }
 0x35d   : > { %1821 = vmatpush3.xpose.msk.msra.mxu1 %vm638_vm1, %v2805_v1  ;;  %1822 = vmatprep.mubr.msk.f32.mxu1 %vm2206_vm0, %v2205_v52  ;;  %v2034_v47 = vpack.c.bf16 %v1067_v44, %v1065_v43  ;;  %v1572_v43 = vld [vmem:[%s3143_s3 + $0x1d8] sm:$0xff] }
 0x35e   : > { %1825 = vmatprep.subr.mxu1 %v2205_v52 }
 0x360   : > { %1823 = vmatmul.mubr.msk.f32.vlgmr.msra.gmra.mrb[6].mxu1 %vm638_vm1, %v894_v45  ;;  %v2032_v45 = vpack.c.bf16 %v1062_v42, %v1060_v40  ;;  %v1567_v40 = vld [vmem:[%s3143_s3 + $0x1b0] sm:$0xff]  ;;  %v1570_v42 = vld [vmem:[%s3143_s3 + $0x1c8] sm:$0xff] }
 0x361   : > { %1827 = vmatprep.mubr.msk.f32.mxu1 %vm2206_vm0, %v2205_v52 }
 0x42f   : > { %v797_v50 = vpop.f32.mrb[4].mxu1 }
 0x430   : > { %v1819_v51 = vpop.f32.mrb[5].mxu1  ;;  %1739 = vmatmul.mubr.msk.f32.vlgmr.msra.gmra.mrb[4].mxu0 %vm638_vm1, %v797_v50  ;;  %v1069_v50 = vld [vmem:[%s3143_s3 + $0xe8] sm:$0xff] }
 0x431   : > { %1831 = vmatpush3.xpose.msk.msra.mxu0 %vm638_vm1, %v2805_v1  ;;  %1832 = vmatprep.mubr.msk.f32.mxu0 %vm2206_vm0, %v2205_v52  ;;  %v1071_v51 = vld [vmem:[%s3143_s3 + $0xf8] sm:$0xff] }
 0x432   : > { %1835 = vmatprep.subr.mxu0 %v2205_v52 }
 0x433   : > { %v963_v57 = vpop.f32.mrb[6].mxu1 }
 0x434   : > { %v1824_v60 = vpop.f32.mrb[7].mxu1  ;;  %1833 = vmatmul.mubr.msk.f32.vlgmr.msra.gmra.mrb[6].mxu0 %vm638_vm1, %v481_v53  ;;  %v967_v7 = vsel %vm715_vm2, %v963_v57, -inf }
 0x435   : > { %1836 = vmatpush3.msra.mxu0 %v2896_v55  ;;  %1837 = vmatprep.mubr.msk.f32.mxu0 %vm2206_vm0, %v2205_v52  ;;  %v1070_v60 = vld [vmem:[%s3143_s3 + $0xf0] sm:$0xff] }
 0x436   : > { %1840 = vmatprep.subr.mxu0 %v2205_v52 }
 0x503   : > { %v2903_v58 = vpop.f32.mrb[4].mxu0 }
 0x504   : > { %v2905_v61 = vpop.f32.mrb[5].mxu0 }
 0x507   : > { %v1217_v54 = vpop.f32.mrb[6].mxu0 }
 0x508   : > { %v1834_v62 = vpop.f32.mrb[7].mxu0  ;;  %v1221_v63 = vsel %vm715_vm2, %v1217_v54, -inf }
 0x509   : > { %1222 = vmax.xlane.f32.xlu1 %v1221_v63  ;;  %v1307_v62 = vld [vmem:[%s3143_s3 + $0x108] sm:$0xff]  ;;  %v1309_v63 = vld [vmem:[%s3143_s3 + $0x118] sm:$0xff] }
 0x596   : > { %v1223_v0 = vpop.xlane.xlu1 %1222 }
 0x597   : > { %v1224_v2 = vsub.f32 %v1217_v54, %v1223_v0  ;;  %v2042_v0 = vpack.c.bf16 %v1309_v63, %v1307_v62 }
 0x599   : > { %v1225_v3 = vmul.f32 1.442695, %v1224_v2 }
 0x59b   : > { %2128 = vpow2.f32 %v1225_v3 }
 0x5a5   : > { %v2129_v4 = vpop.eup %2128 }
 0x5a6   : > { %v1227_v5 = vsel %vm715_vm2, %v2129_v4, 0.0 }
 0x5a7   : > { %1228 = vadd.xlane.f32.xlu1 %v1227_v5 }
 0x5b8   : > { %1398 = vrot.lane.b32.xlu1 %v481_v53, %s2207_s14  ;;  %v2036_v53 = vpack.c.bf16 %v1066_v49, %v1064_v48  ;;  %v1571_v48 = vld [vmem:[%s3143_s3 + $0x1d0] sm:$0xff]  ;;  %v1574_v49 = vld [vmem:[%s3143_s3 + $0x1e8] sm:$0xff] }
 0x5dc   : > { %968 = vmax.xlane.f32.xlu1 %v967_v7 }
 0x5ed   : > { %980 = vrot.lane.b32.xlu1 %v2815_v6, %s2207_s14 }
 0x634   : > { %v1229_v8 = vpop.xlane.xlu1 %1228 }
 0x635   : > { %2130 = vrcp.f32 %v1229_v8  ;;  %v1306_v8 = vld [vmem:[%s3143_s3 + $0x100] sm:$0xff] }
 0x638   : > { %v1399_v12 = vpop.permute.xlu1 %1398 }
 0x63f   : > { %v2131_v9 = vpop.eup %2130 }
 0x640   : > { %v1231_v10 = vmul.f32 0.0625, %v2131_v9  ;;  %v1308_v9 = vld [vmem:[%s3143_s3 + $0x110] sm:$0xff] }
 0x642   : > { %v1232_v11 = vmul.f32 %v2129_v4, %v1231_v10  ;;  %v1311_v10 = vld [vmem:[%s3143_s3 + $0x128] sm:$0xff] }
 0x644   : > { %1838 = vmatmul.mubr.msk.f32.vlgmr.msra.gmra.mrb[8].mxu0 %vm715_vm2, %v1232_v11  ;;  %v1313_v11 = vld [vmem:[%s3143_s3 + $0x138] sm:$0xff] }
 0x645   : > { %1841 = vmatpush3.xpose.msk.msra.mxu0 %vm638_vm1, %v2805_v1  ;;  %1842 = vmatprep.mubr.msk.f32.mxu0 %vm2206_vm0, %v2205_v52 }
 0x646   : > { %1845 = vmatprep.subr.mxu0 %v2205_v52 }
 0x648   : > { %1843 = vmatmul.mubr.msk.f32.vlgmr.msra.gmra.mrb[10].mxu0 %vm638_vm1, %v1399_v12  ;;  %v2044_v12 = vpack.c.bf16 %v1308_v9, %v1306_v8 }
 0x649   : > { %1847 = vmatprep.mubr.msk.f32.mxu0 %vm2206_vm0, %v2205_v52 }
 0x669   : > { %v969_v6 = vpop.xlane.xlu1 %968 }
 0x66a   : > { %v970_v13 = vsub.f32 %v963_v57, %v969_v6  ;;  %v1068_v57 = vld [vmem:[%s3143_s3 + $0xe0] sm:$0xff]  ;;  %v2046_v6 = vpack.c.bf16 %v1313_v11, %v1311_v10 }
 0x66b   : > { %v2040_v54 = vpack.c.bf16 %v1070_v60, %v1068_v57 }
 0x66c   : > { %v971_v15 = vmul.f32 1.442695, %v970_v13  ;;  %v1310_v13 = vld [vmem:[%s3143_s3 + $0x120] sm:$0xff] }
 0x66d   : > { %v981_v14 = vpop.permute.xlu1 %980 }
 0x66e   : > { %1826 = vmatpush3.msra.mxu1 %v981_v14  ;;  %2132 = vpow2.f32 %v971_v15  ;;  %v1312_v14 = vld [vmem:[%s3143_s3 + $0x130] sm:$0xff] }
 0x66f   : > { %2027 = vmatprep.subr.bf16.mxu1 %v2026_v35  ;;  %v1563_v35 = vld [vmem:[%s3143_s3 + $0x190] sm:$0xff] }
 0x670   : > { %v2060_v41 = vpack.c.bf16 %v1563_v35, %v1561_v34 }
 0x678   : > { %v2133_v20 = vpop.eup %2132 }
 0x679   : > { %v973_v21 = vsel %vm715_vm2, %v2133_v20, 0.0 }
 0x717   : > { %v2922_v16 = vpop.f32.mrb[8].mxu0 }
 0x718   : > { %v1839_v1 = vpop.f32.mrb[9].mxu0 }
 0x719   : > { %v1315_v1 = vld [vmem:[%s3143_s3 + $0x148] sm:$0xff] }
 0x71b   : > { %v1468_v17 = vpop.f32.mrb[10].mxu0 }
 0x71c   : > { %v1844_v18 = vpop.f32.mrb[11].mxu0  ;;  %v1472_v19 = vsel %vm715_vm2, %v1468_v17, -inf }
 0x71d   : > { %1473 = vmax.xlane.f32.xlu0 %v1472_v19  ;;  %v2048_v19 = vpack.c.bf16 %v1312_v14, %v1310_v13 }
 0x721   : > { %974 = vadd.xlane.f32.xlu0 %v973_v21  ;;  %v1314_v21 = vld [vmem:[%s3143_s3 + $0x140] sm:$0xff] }
 0x7aa   : > { %v1474_v22 = vpop.xlane.xlu0 %1473 }
 0x7ab   : > { %v1475_v23 = vsub.f32 %v1468_v17, %v1474_v22  ;;  %v1317_v17 = vld [vmem:[%s3143_s3 + $0x158] sm:$0xff]  ;;  %v1316_v22 = vld [vmem:[%s3143_s3 + $0x150] sm:$0xff] }
 0x7ad   : > { %v1476_v24 = vmul.f32 1.442695, %v1475_v23  ;;  %v1319_v23 = vld [vmem:[%s3143_s3 + $0x168] sm:$0xff] }
 0x7ae   : > { %v975_v26 = vpop.xlane.xlu0 %974 }
 0x7af   : > { %2134 = vpow2.f32 %v1476_v24  ;;  %v1321_v24 = vld [vmem:[%s3143_s3 + $0x178] sm:$0xff] }
 0x7b0   : > { %2136 = vrcp.f32 %v975_v26  ;;  %v2052_v26 = vpack.c.bf16 %v1316_v22, %v1314_v21 }
 0x7b9   : > { %v2135_v27 = vpop.eup %2134 }
 0x7ba   : > { %v2137_v28 = vpop.eup %2136  ;;  %v1478_v29 = vsel %vm715_vm2, %v2135_v27, 0.0 }
 0x7bb   : > { %v977_v30 = vmul.f32 0.0625, %v2137_v28  ;;  %1479 = vadd.xlane.f32.xlu0 %v1478_v29  ;;  %v1318_v28 = vld [vmem:[%s3143_s3 + $0x160] sm:$0xff]  ;;  %v1320_v29 = vld [vmem:[%s3143_s3 + $0x170] sm:$0xff] }
 0x7bc   : > { %v2056_v32 = vpack.c.bf16 %v1320_v29, %v1318_v28 }
 0x7bd   : > { %v978_v31 = vmul.f32 %v2133_v20, %v977_v30  ;;  %v2050_v20 = vpack.c.bf16 %v1317_v17, %v1315_v1  ;;  %v1562_v30 = vld [vmem:[%s3143_s3 + $0x188] sm:$0xff] }
 0x7bf   : > { %1828 = vmatmul.mubr.msk.f32.vlgmr.msra.gmra.mrb[8].mxu1 %vm715_vm2, %v978_v31  ;;  %v1564_v31 = vld [vmem:[%s3143_s3 + $0x198] sm:$0xff] }
 0x7c0   : > { %1139 = vmatprep.mubr.f32.mxu1 %v2205_v52  ;;  %2029 = vmatpush1.bf16.msra.mxu1 %v2028_v38  ;;  %v2058_v33 = vpack.c.bf16 %v1564_v31, %v1562_v30  ;;  %v2062_v38 = vpack.c.bf16 %v1568_v37, %v1566_v36 }
 0x7c1   : > { %2031 = vmatprep.subr.bf16.mxu1 %v2030_v39  ;;  %v1565_v39 = vld [vmem:[%s3143_s3 + $0x1a0] sm:$0xff] }
 0x7c2   : > { %v2064_v44 = vpack.c.bf16 %v1567_v40, %v1565_v39 }
 0x7c4   : > { %2033 = vmatpush1.bf16.msra.mxu1 %v2032_v45  ;;  %v2066_v45 = vpack.c.bf16 %v1572_v43, %v1570_v42 }
 0x7c5   : > { %2035 = vmatprep.subr.bf16.mxu1 %v2034_v47  ;;  %v1569_v47 = vld [vmem:[%s3143_s3 + $0x1c0] sm:$0xff] }
 0x7c8   : > { %2037 = vmatpush1.bf16.msra.mxu1 %v2036_v53  ;;  %v1575_v53 = vld [vmem:[%s3143_s3 + $0x1f0] sm:$0xff] }
 0x7d1   : > { %1485 = vrot.lane.b32.xlu0 %v2896_v55, %s2207_s14  ;;  %v2038_v55 = vpack.c.bf16 %v1071_v51, %v1069_v50  ;;  %v1573_v51 = vld [vmem:[%s3143_s3 + $0x1e0] sm:$0xff]  ;;  %s1758_s14 = sshll.u32 %s2260_s22, 8  ;;  %s1656_s22 = scalar_lea.sflag [#allocation3], %s215_s9 }
 0x7d2   : > { %s3098_s26 = scalar_lea.hbm %s3145_s5, %s1758_s14 }
 0x7d3   : > { %2039 = vmatprep.subr.bf16.mxu1 %v2038_v55  ;;  %v2072_v55 = vpack.c.bf16 %v1575_v53, %v1573_v51 }
 0x7d4   : > { %2041 = vmatpush1.bf16.msra.mxu1 %v2040_v54  ;;  %v624_v54 = vld [vmem:[%s3144_s4] sm:$0x3] }
 0x7d5   : > { %2043 = vmatprep.subr.bf16.mxu1 %v2042_v0  ;;  %v629_v62 = vrot.slane %v624_v54, %v389_v59  ;;  %v633_v63 = vrot.slane %v624_v54, %v393_v46 }
 0x7d7   : > { %v636_v0 = vadd.f32 %v629_v62, %v2606_v25 }
 0x848   : > { %v1480_v2 = vpop.xlane.xlu0 %1479 }
 0x849   : > { %2138 = vrcp.f32 %v1480_v2  ;;  %v2140_v2 = vld [vmem:[%s2370_s13 + $0x8] sm:$0xff]  ;;  %s2141_s13 = scalar_lea.vmem %s3100_s16, 256 }
 0x84a   : > { %p2142_p11 = scmp.ne.s32.totalorder %s3100_s16, %s2141_s13  ;;  %p2149_p1 = scmp.lt.s32.totalorder %s2147_s6, %s2141_s13 }
 0x84c   : > { %v1486_v3 = vpop.permute.xlu0 %1485  ;;  %p2143_p12 = pnand %p2142_p11, %p2277_p5  ;;  %p2150_p2 = por %p2149_p1, %p2148_p0 }
 0x84d   : > { %1846 = vmatpush3.msra.mxu0 %v1486_v3  ;;  %v637_v3 = vadd.f32 %v2140_v2, %v633_v63 }
 0x84e   : > { %p2144_p13 = pneg %p2143_p12 }
 0x850   : > { %p2151_p3 = pnand %p2150_p2, %p2144_p13 }
 0x853   : > { %v2139_v4 = vpop.eup %2138 }
 0x854   : > { %v1482_v5 = vmul.f32 0.0625, %v2139_v4  ;;  %v891_v4 = vadd.f32 %v2903_v58, %v636_v0 }
 0x856   : > { %v1483_v7 = vmul.f32 %v2135_v27, %v1482_v5  ;;  %v2054_v27 = vpack.c.bf16 %v1321_v24, %v1319_v23  ;;  %v892_v5 = vadd.f32 %v2905_v61, %v637_v3 }
 0x858   : > { %1848 = vmatmul.mubr.msk.f32.vlgmr.msra.gmra.mrb[12].mxu0 %vm715_vm2, %v1483_v7 }
 0x892   : > { %v1052_v15 = vpop.f32.mrb[8].mxu1 }
 0x893   : > { %v1829_v18 = vpop.f32.mrb[9].mxu1  ;;  %1743 = vmatmul.mubr.msk.f32.vlgmr.msra.gmra.mrb[10].mxu1 %vm638_vm1, %v1052_v15 }
 0x894   : > { %2045 = vmatpush1.bf16.msra.mxu1 %v2044_v12  ;;  %1389 = vmatprep.mubr.f32.mxu1 %v2205_v52 }
 0x895   : > { %2047 = vmatprep.subr.bf16.mxu1 %v2046_v6 }
 0x898   : > { %2049 = vmatpush1.bf16.msra.mxu1 %v2048_v19 }
 0x899   : > { %2051 = vmatprep.subr.bf16.mxu1 %v2050_v20 }
 0x89c   : > { %2053 = vmatpush1.bf16.msra.mxu1 %v2052_v26 }
 0x89d   : > { %2055 = vmatprep.subr.bf16.mxu1 %v2054_v27 }
 0x8a0   : > { %2057 = vmatpush1.bf16.msra.mxu1 %v2056_v32 }
 0x8a1   : > { %2059 = vmatprep.subr.bf16.mxu1 %v2058_v33 }
 0x8a3   : > { %1747 = vmatmul.mubr.msk.f32.vlgmr.msra.gmra.mrb[10].mxu1 %vm638_vm1, %v2922_v16  ;;  %v1576_v16 = vld [vmem:[%s3143_s3 + $0x1f8] sm:$0xff] }
 0x8a4   : > { %2061 = vmatpush1.bf16.msra.mxu1 %v2060_v41  ;;  %1644 = vmatprep.mubr.f32.mxu1 %v2205_v52  ;;  %v2068_v52 = vpack.c.bf16 %v1571_v48, %v1569_v47  ;;  %v2070_v50 = vpack.c.bf16 %v1576_v16, %v1574_v49 }
 0x8a5   : > { %2063 = vmatprep.subr.bf16.mxu1 %v2062_v38 }
 0x8a8   : > { %2065 = vmatpush1.bf16.msra.mxu1 %v2064_v44 }
 0x8a9   : > { %2067 = vmatprep.subr.bf16.mxu1 %v2066_v45 }
 0x8ac   : > { %2069 = vmatpush1.bf16.msra.mxu1 %v2068_v52 }
 0x8ad   : > { %2071 = vmatprep.subr.bf16.mxu1 %v2070_v50 }
 0x8b0   : > { %2073 = vmatpush1.bf16.msra.mxu1 %v2072_v55 }
 0x92b   : > { %v1557_v57 = vpop.f32.mrb[12].mxu0 }
 0x92c   : > { %v1849_v60 = vpop.f32.mrb[13].mxu0  ;;  %1751 = vmatmul.mubr.msk.f32.vlgmr.msra.gmra.mrb[10].mxu1 %vm638_vm1, %v1557_v57 }
 0x9ff   : > { %v1646_v7 = vpop.f32.mrb[10].mxu1 }
 0xa00   : > { %v2075_v8 = vadd.f32 %v1646_v7, %v891_v4  ;;  %v1648_v9 = vpop.f32.mrb[11].mxu1 }
 0xa01   : > { %v2077_v59 = vadd.f32 %v1648_v9, %v892_v5 }
 0xa02   : > { %1653 = vst [vmem:[%s217_s15] sm:$0xff] %v2075_v8 }
 0xa03   : > { %1654 = vst [vmem:[%s217_s15 + $0x8] sm:$0xff] %v2077_v59 }
 0xa04   : > { %2154 = shalt.err (!%p2151_p3)
}
 0xa05   : > { %s2155_s7 = scalar_lea.hbm %s3098_s26, 256  ;;  %s2159_s11 = scalar_lea.hbm %s3145_s5, 512 }
 0xa06   : > { %p2156_p4 = scmp.ne.s32.totalorder %s3098_s26, %s2155_s7  ;;  %p2160_p9 = scmp.lt.u32.totalorder %s3098_s26, %s3145_s5 }
 0xa07   : > { %p2161_p10 = scmp.lt.u32.totalorder %s2159_s11, %s2155_s7  ;;  %p2163_p12 = scmp.lt.u32.totalorder %s2155_s7, %s3098_s26 }
 0xa08   : > { %p2157_p7 = pnand %p2156_p4, %p2277_p5 }
 0xa09   : > { %p2162_p11 = por %p2161_p10, %p2160_p9 }
 0xa0a   : > { %p2158_p8 = pneg %p2157_p7 }
 0xa0b   : > { %p2164_p13 = por %p2163_p12, %p2162_p11 }
 0xa0d   : > { %p2165_p0 = pnand %p2164_p13, %p2158_p8 }
 0xa0f   : > { %2168 = shalt.err (!%p2165_p0)
}
 0xa10   : > { %2082 = dma.vmem_to_hbm [thread:$0]  (%p2277_p5), %s3100_s16, 256, %s3098_s26, %s1656_s22  }
 0xa11 PF: > { %p2088_p1 = scmp.ge.s32.totalorder %s2203_s21, 2  ;;  %s1682_s14 = sand.u32 1, %s2191_s18  }
 0xa12   : > { %s1683_s15 = scalar_lea.sflag [#allocation3], %s1682_s14 }
 0xa13   : > { %p2085_p2 = pnand %p2088_p1, %p2281_p6 }
 0xa15   : > { %2186 = dma.done.wait (!%p2085_p2), %s1683_s15, 256  }
 0xa16   : > { %2188 = vsyncadd (!%p2085_p2), %s1683_s15, 4294967040  ;;  %p15_p3 = scmp.ge.s32.totalorder %s2264_s24, 4   ;;  %s3148_s18 = smov %s2195_s19 }
 0xa17   : > { %s3149_s19 = smov %s2199_s20  ;;  %s3150_s20 = smov %s2275_s27 }
 0xa18   : > { %s3151_s21 = smov %s2264_s24  ;;  %17 = sbr.rel (!%p15_p3) target bundleno = 3 (0x3), region = 75 }
 0xa1f   :  { %1688 = vsyncpa [#allocation3], 1 }
 0xa20   :  { %1690 = vsyncpa [#allocation3 + $0x1], 1 }

</bundles_post_ra>
